<compile_context>
chip_gen: v6e
topology: v6e:2x2x1
jax: 0.10.0
libtpu: 0.0.40
codegen_flags: <defaults>
</compile_context>

<pallas_src>
import functools

import jax
import jax.numpy as jnp
from jax.experimental import pallas as pl
from jax.experimental.pallas import tpu as pltpu


def _round_up(x, m):
    return (x + m - 1) // m * m


def _embed_logits(idx_tile, table, out_shape):
    """one_hot(idx) @ table on the MXU.  Exact gather (0/1 weights, f32 acc)."""
    tile_n, vp = out_shape
    col = jax.lax.broadcasted_iota(jnp.int32, (tile_n, vp), 1)
    onehot = (col == idx_tile).astype(jnp.float32)             # (tile_n, Vp)
    logits = jnp.dot(onehot, table, preferred_element_type=jnp.float32)
    return logits, col


def _bigram_logits_kernel(idx_ref, table_ref, logits_ref):
    # idx_ref: (TILE_N, 1) i32, table_ref: (Vp, Vp) f32, logits_ref: (TILE_N, Vp) f32
    logits, _ = _embed_logits(idx_ref[...], table_ref[...], logits_ref.shape)
    logits_ref[...] = logits


def _bigram_loss_kernel(idx_ref, tgt_ref, table_ref, logits_ref, loss_ref, *,
                        vocab, n_valid):
    # loss_ref: (1,) f32 in SMEM, accumulated across the grid (axis "arbitrary").
    i = pl.program_id(0)
    tile_n, vp = logits_ref.shape

    logits, col = _embed_logits(idx_ref[...], table_ref[...], logits_ref.shape)
    logits_ref[...] = logits

    # Cross entropy restricted to the real vocab lanes (padded lanes -> -1e30,
    # which underflows to 0 in the exp and never wins the max).
    lane_valid = col < vocab
    masked = jnp.where(lane_valid, logits, jnp.float32(-1e30))
    m = jnp.max(masked, axis=-1, keepdims=True)
    lse = m + jnp.log(jnp.sum(jnp.exp(masked - m), axis=-1, keepdims=True))
    # Target pick folded into a masked sum (no second one-hot f32 temporary).
    picked = jnp.sum(jnp.where(col == tgt_ref[...], logits, 0.0),
                     axis=-1, keepdims=True)

    # Exclude padded rows from the mean.
    row = jax.lax.broadcasted_iota(jnp.int32, (tile_n, 1), 0) + i * tile_n
    partial = jnp.sum(jnp.where(row < n_valid, lse - picked, 0.0))

    @pl.when(i == 0)
    def _():
        loss_ref[0] = 0.0

    loss_ref[0] += partial * (1.0 / n_valid)


def bigram_forward(idx, table, targets=None):
    """idx: (B, T) int32, table: (V, V) f32 embedding table.

    Returns (logits, loss):
      - targets is None: logits (B, T, V), loss None
      - targets given:   logits (B*T, V), loss scalar f32 (mean cross entropy)
    """
    B, T = idx.shape
    V = table.shape[0]
    N = B * T

    VP = _round_up(V, 128)                 # lane-dense vocab axis
    TILE_N = min(256, _round_up(N, 8))     # MXU-friendly row tile, bounded VMEM
    NP = _round_up(N, TILE_N)
    n_tiles = NP // TILE_N

    idx_col = jnp.pad(idx.reshape(N, 1).astype(jnp.int32), ((0, NP - N), (0, 0)))
    table_p = jnp.pad(table.astype(jnp.float32), ((0, VP - V), (0, VP - V)))

    idx_spec = pl.BlockSpec((TILE_N, 1), lambda i: (i, 0))
    table_spec = pl.BlockSpec((VP, VP), lambda i: (0, 0))       # resident in VMEM
    logits_spec = pl.BlockSpec((TILE_N, VP), lambda i: (i, 0))  # lane-dense output

    vmem_limit = 32 * 1024 * 1024  # explicit: safe on v7x's 64 MiB physical VMEM

    if targets is None:
        logits_p = pl.pallas_call(
            _bigram_logits_kernel,
            out_shape=jax.ShapeDtypeStruct((NP, VP), jnp.float32),
            grid=(n_tiles,),
            in_specs=[idx_spec, table_spec],
            out_specs=logits_spec,
            compiler_params=pltpu.CompilerParams(
                dimension_semantics=("parallel",),
                vmem_limit_bytes=vmem_limit),
        )(idx_col, table_p)
        return logits_p[:N, :V].reshape(B, T, V), None

    tgt_col = jnp.pad(targets.reshape(N, 1).astype(jnp.int32),
                      ((0, NP - N), (0, 0)))
    kernel = functools.partial(_bigram_loss_kernel, vocab=V, n_valid=N)
    logits_p, loss = pl.pallas_call(
        kernel,
        out_shape=(jax.ShapeDtypeStruct((NP, VP), jnp.float32),
                   jax.ShapeDtypeStruct((1,), jnp.float32)),
        grid=(n_tiles,),
        in_specs=[idx_spec, idx_spec, table_spec],
        out_specs=(logits_spec, pl.BlockSpec(memory_space=pltpu.SMEM)),
        compiler_params=pltpu.CompilerParams(
            dimension_semantics=("arbitrary",),   # loss accumulates across tiles
            vmem_limit_bytes=vmem_limit),
    )(idx_col, tgt_col, table_p)
    return logits_p[:N, :V], loss[0]


if __name__ == "__main__":
    key = jax.random.PRNGKey(0)
    k_tab, k_idx, k_tgt = jax.random.split(key, 3)

    vocab_size = 65          # e.g. tiny-shakespeare char vocab
    B, T = 2, 8

    # nn.Embedding default init ~ N(0, 1)
    table = jax.random.normal(k_tab, (vocab_size, vocab_size), dtype=jnp.float32)
    idx = jax.random.randint(k_idx, (B, T), 0, vocab_size, dtype=jnp.int32)
    targets = jax.random.randint(k_tgt, (B, T), 0, vocab_size, dtype=jnp.int32)

    logits, loss = bigram_forward(idx, table, targets)
    logits = jax.block_until_ready(logits)
    loss = jax.block_until_ready(loss)

    # pure-JAX reference check
    ref_logits = table[idx.reshape(-1)]                          # (B*T, V)
    ref_lse = jax.scipy.special.logsumexp(ref_logits, axis=-1)
    ref_loss = jnp.mean(
        ref_lse - jnp.take_along_axis(ref_logits,
                                      targets.reshape(-1, 1), axis=-1)[:, 0])
    assert logits.shape == (B * T, vocab_size)
    assert jnp.allclose(logits, ref_logits, atol=1e-5)
    assert jnp.allclose(loss, ref_loss, atol=1e-5)

    # also exercise the targets=None path (shape (B, T, V), loss None)
    logits3d, loss_none = bigram_forward(idx, table, None)
    logits3d = jax.block_until_ready(logits3d)
    assert logits3d.shape == (B, T, vocab_size) and loss_none is None
    assert jnp.allclose(logits3d.reshape(B * T, vocab_size), ref_logits, atol=1e-5)

    print("KERNEL_OK")
</pallas_src>

<mosaic_0001>
module attributes {stable_mosaic.version = 11 : i64} {
  func.func @_bigram_loss_kernel(%arg0: i32, %arg1: memref<16x1xi32, #tpu.memory_space<vmem>>, %arg2: memref<16x1xi32, #tpu.memory_space<vmem>>, %arg3: memref<128x128xf32, #tpu.memory_space<vmem>>, %arg4: memref<16x128xf32, #tpu.memory_space<vmem>>, %arg5: memref<1xf32, #tpu.memory_space<smem>>) attributes {dimension_semantics = [#tpu.dimension_semantics<arbitrary>], iteration_bounds = array<i64: 1>, scalar_prefetch = 0 : i64, scratch_operands = 0 : i64, tpu.core_type = #tpu.core_type<tc>, window_params = [{transform_indices = @transform_0, window_bounds = array<i64: 16, 1>}, {transform_indices = @transform_1, window_bounds = array<i64: 16, 1>}, {pipeline_mode = #tpu.pipeline_mode<synchronous>, transform_indices = @transform_2, window_bounds = array<i64: 128, 128>}, {transform_indices = @transform_3, window_bounds = array<i64: 16, 128>}, {transform_indices = @transform_4, window_bounds = array<i64: 1>}]} {
    %c0 = arith.constant 0 : index
    %c0_0 = arith.constant 0 : index
    %0 = vector.load %arg1[%c0, %c0_0] : memref<16x1xi32, #tpu.memory_space<vmem>>, vector<16x1xi32>
    %c0_1 = arith.constant 0 : index
    %c0_2 = arith.constant 0 : index
    %1 = vector.load %arg3[%c0_1, %c0_2] : memref<128x128xf32, #tpu.memory_space<vmem>>, vector<128x128xf32>
    %2 = tpu.iota {dimensions = array<i32: 1>} : vector<16x128xi32>
    %3 = vector.broadcast %0 : vector<16x1xi32> to vector<16x128xi32>
    %4 = arith.cmpi eq, %2, %3 : vector<16x128xi32>
    %5 = arith.extui %4 : vector<16x128xi1> to vector<16x128xi32>
    %6 = arith.sitofp %5 : vector<16x128xi32> to vector<16x128xf32>
    %cst = arith.constant dense<0.000000e+00> : vector<16x128xf32>
    %7 = tpu.matmul %6, %1, %cst {dimension_numbers = #tpu.dot_dimension_numbers<[1], [0], [0], [1], [0, 0, 1, 1], [], []>} : vector<16x128xf32>, vector<128x128xf32>, vector<16x128xf32> -> vector<16x128xf32>
    %c0_3 = arith.constant 0 : index
    %c0_4 = arith.constant 0 : index
    %8 = vector.load %arg4[%c0_3, %c0_4] : memref<16x128xf32, #tpu.memory_space<vmem>>, vector<16x128xf32>
    tpu.vector_store %arg4[%c0_3, %c0_4], %7 {strides = array<i32>} : memref<16x128xf32, #tpu.memory_space<vmem>>, vector<16x128xf32>,
    %c65_i32 = arith.constant 65 : i32
    %9 = vector.broadcast %c65_i32 : i32 to vector<16x128xi32>
    %10 = arith.cmpi slt, %2, %9 : vector<16x128xi32>
    %cst_5 = arith.constant -1.000000e+30 : f32
    %11 = vector.broadcast %cst_5 : f32 to vector<16x128xf32>
    %12 = arith.select %10, %7, %11 : vector<16x128xi1>, vector<16x128xf32>
    %cst_6 = arith.constant dense<0xFF800000> : vector<16xf32>
    %13 = vector.multi_reduction <maximumf>, %12, %cst_6 [1] : vector<16x128xf32> to vector<16xf32>
    %14 = vector.shape_cast %13 : vector<16xf32> to vector<16x1xf32>
    %15 = vector.broadcast %14 : vector<16x1xf32> to vector<16x128xf32>
    %16 = arith.subf %12, %15 : vector<16x128xf32>
    %17 = math.exp %16 : vector<16x128xf32>
    %cst_7 = arith.constant dense<0.000000e+00> : vector<16xf32>
    %18 = vector.multi_reduction <add>, %17, %cst_7 [1] : vector<16x128xf32> to vector<16xf32>
    %19 = vector.shape_cast %18 : vector<16xf32> to vector<16x1xf32>
    %20 = math.log %19 : vector<16x1xf32>
    %21 = arith.addf %14, %20 : vector<16x1xf32>
    %c0_8 = arith.constant 0 : index
    %c0_9 = arith.constant 0 : index
    %22 = vector.load %arg2[%c0_8, %c0_9] : memref<16x1xi32, #tpu.memory_space<vmem>>, vector<16x1xi32>
    %23 = vector.broadcast %22 : vector<16x1xi32> to vector<16x128xi32>
    %24 = arith.cmpi eq, %2, %23 : vector<16x128xi32>
    %cst_10 = arith.constant 0.000000e+00 : f32
    %25 = vector.broadcast %cst_10 : f32 to vector<16x128xf32>
    %26 = arith.select %24, %7, %25 : vector<16x128xi1>, vector<16x128xf32>
    %cst_11 = arith.constant dense<0.000000e+00> : vector<16xf32>
    %27 = vector.multi_reduction <add>, %26, %cst_11 [1] : vector<16x128xf32> to vector<16xf32>
    %28 = vector.shape_cast %27 : vector<16xf32> to vector<16x1xf32>
    %29 = tpu.iota {dimensions = array<i32: 0>} : vector<16x1xi32>
    %c16_i32 = arith.constant 16 : i32
    %30 = arith.muli %arg0, %c16_i32 : i32
    %31 = vector.broadcast %30 : i32 to vector<16x1xi32>
    %32 = arith.addi %29, %31 : vector<16x1xi32>
    %c16_i32_12 = arith.constant 16 : i32
    %33 = vector.broadcast %c16_i32_12 : i32 to vector<16x1xi32>
    %34 = arith.cmpi slt, %32, %33 : vector<16x1xi32>
    %35 = arith.subf %21, %28 : vector<16x1xf32>
    %cst_13 = arith.constant 0.000000e+00 : f32
    %36 = vector.broadcast %cst_13 : f32 to vector<16x1xf32>
    %37 = arith.select %34, %35, %36 : vector<16x1xi1>, vector<16x1xf32>
    %38 = vector.shape_cast %37 : vector<16x1xf32> to vector<1x16x1xf32>
    %cst_14 = arith.constant dense<0.000000e+00> : vector<1xf32>
    %39 = vector.multi_reduction <add>, %38, %cst_14 [1, 2] : vector<1x16x1xf32> to vector<1xf32>
    %40 = vector.shape_cast %39 : vector<1xf32> to vector<1x1x1xf32>
    %41 = vector.extract %40[0, 0, 0] : f32 from vector<1x1x1xf32>
    %c0_i32 = arith.constant 0 : i32
    %42 = arith.cmpi eq, %arg0, %c0_i32 : i32
    %43 = arith.extui %42 : i1 to i32
    %c0_i32_15 = arith.constant 0 : i32
    %44 = arith.cmpi ne, %43, %c0_i32_15 : i32
    scf.if %44 {
      %cst_19 = arith.constant 0.000000e+00 : f32
      %c0_20 = arith.constant 0 : index
      %49 = memref.load %arg5[%c0_20] : memref<1xf32, #tpu.memory_space<smem>>
      memref.store %cst_19, %arg5[%c0_20] : memref<1xf32, #tpu.memory_space<smem>>
    } else {
    }
    %c0_16 = arith.constant 0 : index
    %45 = memref.load %arg5[%c0_16] : memref<1xf32, #tpu.memory_space<smem>>
    %cst_17 = arith.constant 6.250000e-02 : f32
    %46 = arith.mulf %41, %cst_17 : f32
    %47 = arith.addf %45, %46 : f32
    %c0_18 = arith.constant 0 : index
    %48 = memref.load %arg5[%c0_18] : memref<1xf32, #tpu.memory_space<smem>>
    memref.store %47, %arg5[%c0_18] : memref<1xf32, #tpu.memory_space<smem>>
    return
  }
  func.func @transform_0(%arg0: i32) -> (i32, i32) {
    %c0_i32 = arith.constant 0 : i32
    %c0_i32_0 = arith.constant 0 : i32
    return %arg0, %c0_i32 : i32, i32
  }
  func.func @transform_1(%arg0: i32) -> (i32, i32) {
    %c0_i32 = arith.constant 0 : i32
    %c0_i32_0 = arith.constant 0 : i32
    return %arg0, %c0_i32 : i32, i32
  }
  func.func @transform_2(%arg0: i32) -> (i32, i32) {
    %c0_i32 = arith.constant 0 : i32
    %c0_i32_0 = arith.constant 0 : i32
    %c0_i32_1 = arith.constant 0 : i32
    return %c0_i32, %c0_i32_0 : i32, i32
  }
  func.func @transform_3(%arg0: i32) -> (i32, i32) {
    %c0_i32 = arith.constant 0 : i32
    %c0_i32_0 = arith.constant 0 : i32
    return %arg0, %c0_i32 : i32, i32
  }
  func.func @transform_4(%arg0: i32) -> i32 {
    %c0_i32 = arith.constant 0 : i32
    %c0_i32_0 = arith.constant 0 : i32
    return %c0_i32 : i32
  }
}

</mosaic_0001>

<bundles_post_ra>
// kernel: tpu_custom_call.1
= control target key start
LH: loop header
LB: loop body
LE: loop exit
PB: predicated region body
PF: predicated region fallthrough
CT: control target
= control target key end

     0   :  { %10 = vsyncpa [#allocation3], 0  ;;  %s437_s0 = inlined_call_operand.vmem [shape: s32[16,1], index: 0, kind: input, shape index: {}]   ;;  %s438_s1 = inlined_call_operand.vmem [shape: s32[16,1], index: 1, kind: input, shape index: {}]   ;;  %s439_s2 = inlined_call_operand.hbm [shape: f32[128,128], index: 2, kind: input, shape index: {}]   ;;  %s440_s3 = inlined_call_operand.hbm [shape: f32[16,128], index: 3, kind: output, shape index: {0}]   ;;  %s441_s4 = inlined_call_operand.hbm [shape: f32[1], index: 4, kind: output, shape index: {1}]  }
   0x1   :  { %11 = vsyncpa [#allocation4], 0 }
   0x2   :  { %12 = vsyncpa [#allocation5], 0  ;;  %s378_s15 = smov [#allocation2]  }
   0x3   :  { %s22_s16 = sshll.u32 %s378_s15, 4  ;;  %s23_s16 = int_to_ptr.vmem [resolvable:$true] %s22_s16 }
   0x4   :  { %s332_s17 = scalar_lea.vmem %s23_s16, 2048  ;;  %p337_p1 = scmp.lt.s32.totalorder %s23_s16, %s23_s16 }
   0x5   :  { %p333_p0 = scmp.ne.s32.totalorder %s23_s16, %s332_s17  ;;  %p338_p2 = scmp.lt.s32.totalorder %s332_s17, %s332_s17 }
   0x7   :  { %p339_p3 = por %p338_p2, %p337_p1 }
   0x9   :  { %p340_p4 = pnand %p339_p3, %p333_p0 }
   0xb   :  { %343 = shalt.err (!%p340_p4)
}
   0xc   :  { %s379_s18 = smov 128   ;;  %s380_s19 = smov 8  }
   0xd   :  { %28 = dma.hbm_to_vmem [thread:$0]  %s439_s2, 2048, %s23_s16, [#allocation3], %s379_s18, %s379_s18, %s380_s19  }
   0xe   :  { %372 = dma.done.wait [#allocation3], 2048  }
   0xf   :  { %373 = vsyncadd [#allocation3], 4294965248  ;;  %v381_v0 = vmov 0   ;;  %v32_v1 = vld [vmem:[%s437_s0] sm:$0xff]  ;;  %v49_v2 = vld [vmem:[#allocation2 + $0x78] sm:$0xff]  ;;  %v50_v20 = vlaneseq  ;;  %v382_v23 = vmov 1.0  }
  0x10   :  { %314 = vset.pattern.permute.xlu0 %v381_v0  ;;  %315 = vset.pattern.permute.xlu1 %v381_v0  ;;  %v48_v3 = vld [vmem:[#allocation2 + $0x70] sm:$0xff]  ;;  %v33_v4 = vld [vmem:[%s437_s0 + $0x8] sm:$0xff]  ;;  %v46_v6 = vld [vmem:[#allocation2 + $0x60] sm:$0xff]  ;;  %vm193_vm5 = vcmask 7168  }
  0x11   :  { %53 = vperm.xlu0 %314, %v32_v1   ;;  %269 = vmatprep.subr.mxu0 %v49_v2  ;;  %v47_v5 = vld [vmem:[#allocation2 + $0x68] sm:$0xff]  ;;  %v164_v7 = vld [vmem:[%s438_s1] sm:$0xff]  ;;  %v45_v8 = vld [vmem:[#allocation2 + $0x58] sm:$0xff]  ;;  %v51_v21 = vand.u32 127, %v50_v20 }
  0x12   :  { %270 = vmatpush3.msra.mxu0 %v49_v2  ;;  %v44_v9 = vld [vmem:[#allocation2 + $0x50] sm:$0xff]  ;;  %v43_v10 = vld [vmem:[#allocation2 + $0x48] sm:$0xff]  ;;  %v42_v11 = vld [vmem:[#allocation2 + $0x40] sm:$0xff] }
  0x13   :  { %271 = vmatprep.subr.mxu0 %v48_v3  ;;  %v41_v12 = vld [vmem:[#allocation2 + $0x38] sm:$0xff]  ;;  %v40_v13 = vld [vmem:[#allocation2 + $0x30] sm:$0xff]  ;;  %v39_v14 = vld [vmem:[#allocation2 + $0x28] sm:$0xff]  ;;  %vm141_vm2 = vcmp.lt.s32.totalorder %v51_v21, 65 }
  0x14   :  { %272 = vmatpush3.msra.mxu0 %v48_v3  ;;  %v38_v15 = vld [vmem:[#allocation2 + $0x20] sm:$0xff]  ;;  %v37_v16 = vld [vmem:[#allocation2 + $0x18] sm:$0xff]  ;;  %v36_v17 = vld [vmem:[#allocation2 + $0x10] sm:$0xff] }
  0x15   :  { %56 = vperm.xlu0 %314, %v33_v4   ;;  %273 = vmatprep.subr.mxu0 %v47_v5  ;;  %v35_v18 = vld [vmem:[#allocation2 + $0x8] sm:$0xff]  ;;  %v34_v19 = vld [vmem:[#allocation2] sm:$0xff] }
  0x16   :  { %274 = vmatpush3.msra.mxu0 %v47_v5  ;;  %v165_v29 = vld [vmem:[%s438_s1 + $0x8] sm:$0xff]  ;;  %s383_s1 = smov [#allocation6]  }
  0x17   :  { %275 = vmatprep.subr.mxu0 %v46_v6  ;;  %s222_s28 = sshll.u32 %s383_s1, 4  ;;  %s223_s28 = int_to_ptr.vmem [resolvable:$true] %s222_s28 }
  0x18   :  { %276 = vmatpush3.msra.mxu0 %v46_v6  ;;  %s344_s29 = scalar_lea.vmem %s223_s28, 256  ;;  %p349_p6 = scmp.lt.s32.totalorder %s223_s28, %s223_s28 }
  0x19   :  { %167 = vperm.xlu0 %314, %v164_v7   ;;  %277 = vmatprep.subr.mxu0 %v45_v8  ;;  %p345_p5 = scmp.ne.s32.totalorder %s223_s28, %s344_s29  ;;  %p350_p7 = scmp.lt.s32.totalorder %s344_s29, %s344_s29 }
  0x1a   :  { %278 = vmatpush3.msra.mxu0 %v45_v8 }
  0x1b   :  { %279 = vmatprep.subr.mxu0 %v44_v9  ;;  %p351_p8 = por %p350_p7, %p349_p6 }
  0x1c   :  { %280 = vmatpush3.msra.mxu0 %v44_v9 }
  0x1d   :  { %281 = vmatprep.subr.mxu0 %v43_v10  ;;  %p352_p9 = pnand %p351_p8, %p345_p5 }
  0x1e   :  { %282 = vmatpush3.msra.mxu0 %v43_v10 }
  0x1f   :  { %283 = vmatprep.subr.mxu0 %v42_v11 }
  0x20   :  { %284 = vmatpush3.msra.mxu0 %v42_v11 }
  0x21   :  { %285 = vmatprep.subr.mxu0 %v41_v12 }
  0x22   :  { %286 = vmatpush3.msra.mxu0 %v41_v12 }
  0x23   :  { %287 = vmatprep.subr.mxu0 %v40_v13 }
  0x24   :  { %288 = vmatpush3.msra.mxu0 %v40_v13 }
  0x25   :  { %289 = vmatprep.subr.mxu0 %v39_v14 }
  0x26   :  { %290 = vmatpush3.msra.mxu0 %v39_v14 }
  0x27   :  { %291 = vmatprep.subr.mxu0 %v38_v15 }
  0x28   :  { %292 = vmatpush3.msra.mxu0 %v38_v15 }
  0x29   :  { %293 = vmatprep.subr.mxu0 %v37_v16 }
  0x2a   :  { %294 = vmatpush3.msra.mxu0 %v37_v16 }
  0x2b   :  { %295 = vmatprep.subr.mxu0 %v36_v17 }
  0x2c   :  { %296 = vmatpush3.msra.mxu0 %v36_v17 }
  0x2d   :  { %297 = vmatprep.subr.mxu0 %v35_v18 }
  0x2e   :  { %298 = vmatpush3.msra.mxu0 %v35_v18 }
  0x2f   :  { %299 = vmatprep.subr.mxu0 %v34_v19 }
  0x30   :  { %300 = vmatpush3.msra.mxu0 %v34_v19 }
  0x8c   :  { %v54_v22 = vpop.permute.xlu0 %53 }
  0x8d   :  { %vm58_vm0 = vcmp.eq.s32.totalorder %v51_v21, %v54_v22 }
  0x8e   :  { %301 = vmatprep.mubr.msk.f32.mxu0 %vm58_vm0, %v382_v23 }
  0x90   :  { %v57_v24 = vpop.permute.xlu0 %56 }
  0x91   :  { %vm59_vm1 = vcmp.eq.s32.totalorder %v51_v21, %v57_v24 }
  0x92   :  { %302 = vmatmul.mubr.msk.f32.vlgmr.msra.gmra.mxu0 %vm59_vm1, %v382_v23 }
  0x94   :  { %v168_v37 = vpop.permute.xlu0 %167 }
  0x95   :  { %vm172_vm3 = vcmp.eq.s32.totalorder %v51_v21, %v168_v37 }
 0x152   :  { %v303_v25 = vpop.f32.mrf.mxu0 }
 0x153   :  { %140 = vst [vmem:[#allocation6 + $0x8] sm:$0xff] %v303_v25  ;;  %v143_v28 = vsel %vm141_vm2, %v303_v25, -1e+30 }
 0x154   :  { %v130_v26 = vpop.f32.mrf.mxu0 }
 0x155   :  { %139 = vst [vmem:[#allocation6] sm:$0xff] %v130_v26  ;;  %v142_v27 = vsel %vm141_vm2, %v130_v26, -1e+30  ;;  %v174_v40 = vsel %vm172_vm3, %v130_v26, 0.0 }
 0x156   :  { %144 = vmax.xlane.f32.xlu1 %v142_v27 }
 0x15a   :  { %146 = vmax.xlane.f32.xlu1 %v143_v28 }
 0x16b   :  { %170 = vperm.xlu1 %315, %v165_v29  }
 0x1df   :  { %v145_v30 = vpop.xlane.xlu1 %144 }
 0x1e0   :  { %v148_v31 = vsub.f32 %v142_v27, %v145_v30 }
 0x1e2   :  { %v150_v32 = vmul.f32 1.442695, %v148_v31 }
 0x1e3   :  { %v147_v33 = vpop.xlane.xlu1 %146 }
 0x1e4   :  { %316 = vpow2.f32 %v150_v32  ;;  %v149_v34 = vsub.f32 %v143_v28, %v147_v33 }
 0x1e6   :  { %v152_v35 = vmul.f32 1.442695, %v149_v34 }
 0x1e7   :  { %v171_v38 = vpop.permute.xlu1 %170 }
 0x1e8   :  { %318 = vpow2.f32 %v152_v35  ;;  %vm173_vm4 = vcmp.eq.s32.totalorder %v51_v21, %v171_v38 }
 0x1e9   :  { %v175_v41 = vsel %vm173_vm4, %v303_v25, 0.0 }
 0x1f1   :  { %v317_v36 = vpop.eup %316 }
 0x1f2   :  { %154 = vadd.xlane.f32.xlu0 %v317_v36 }
 0x1f5   :  { %v319_v39 = vpop.eup %318 }
 0x1f6   :  { %156 = vadd.xlane.f32.xlu1 %v319_v39  ;;  %176 = vadd.xlane.f32.xlu0 %v174_v40 }
 0x1fa   :  { %178 = vadd.xlane.f32.xlu0 %v175_v41 }
 0x27b   :  { %v155_v42 = vpop.xlane.xlu0 %154 }
 0x27c   :  { %320 = vlog2.f32 %v155_v42 }
 0x27f   :  { %v157_v43 = vpop.xlane.xlu1 %156  ;;  %v177_v46 = vpop.xlane.xlu0 %176 }
 0x280   :  { %322 = vlog2.f32 %v157_v43 }
 0x283   :  { %v179_v52 = vpop.xlane.xlu0 %178 }
 0x289   :  { %v321_v44 = vpop.eup %320 }
 0x28a   :  { %v159_v45 = vmul.f32 0.6931472, %v321_v44 }
 0x28c   :  { %v162_v47 = vadd.f32 %v159_v45, %v145_v30 }
 0x28d   :  { %v323_v48 = vpop.eup %322 }
 0x28e   :  { %v161_v49 = vmul.f32 0.6931472, %v323_v48  ;;  %v189_v50 = vsub.f32 %v162_v47, %v177_v46 }
 0x290   :  { %v163_v51 = vadd.f32 %v161_v49, %v147_v33  ;;  %v194_v54 = vsel %vm193_vm5, %v189_v50, 0.0 }
 0x292   :  { %v190_v53 = vsub.f32 %v163_v51, %v179_v52 }
 0x294   :  { %v195_v55 = vsel %vm193_vm5, %v190_v53, 0.0 }
 0x295   :  { %v196_v56 = vadd.f32 %v195_v55, %v194_v54 }
 0x297   :  { %197 = vadd.xlane.f32.xlu0 %v196_v56 }
 0x298   :  { %355 = shalt.err (!%p352_p9)
}
 0x299   :  { %228 = dma.vmem_to_hbm [thread:$0]  %s223_s28, 256, %s440_s3, [#allocation4], %s379_s18, %s379_s18, %s380_s19  }
 0x29a   :  { %s384_s8 = smov [#allocation7]  }
 0x320   :  { %v198_v57 = vpop.xlane.xlu0 %197 }
 0x321   :  { %v199_v58 = vrot.slane %v198_v57, 4 }
 0x323   :  { %v200_v59 = vadd.f32 %v199_v58, %v198_v57 }
 0x325   :  { %v201_v60 = vrot.slane %v200_v59, 2 }
 0x327   :  { %v202_v61 = vadd.f32 %v201_v60, %v200_v59 }
 0x329   :  { %v203_v62 = vrot.slane %v202_v61, 1 }
 0x32b   :  { %v204_v63 = vadd.f32 %v203_v62, %v202_v61 }
 0x32d   :  { %304 = vpush %v204_v63 }
 0x35e   :  { %s305_s6 = spop %304 }
 0x35f   :  { %s213_s7 = smul.f32 0.0625, %s305_s6 }
 0x361   :  { %216 = sst [smem:[#allocation7]] %s213_s7 }
 0x362   :  { %236 = dma.smem_to_hbm %s384_s8, 16, %s441_s4, [#allocation5]  }
 0x363   :  { %374 = dma.done.wait [#allocation4], 256  }
 0x364   :  { %375 = vsyncadd [#allocation4], 4294967040 }
 0x365   :  { %376 = dma.done.wait [#allocation5], 16  }
 0x366   :  { %377 = vsyncadd [#allocation5], 4294967280 }
 0x367   :  { %243 = sfence }
 0x368   :  { %244 = vsyncpa [#allocation3], 1 }
 0x369   :  { %245 = vsyncpa [#allocation4], 1 }
 0x36a   :  { %246 = vsyncpa [#allocation5], 1 }

</bundles_post_ra>
